<compile_context>
chip_gen: v7x
topology: tpu7x:2x2x1
jax: 0.10.0
libtpu: 0.0.40
codegen_flags: <defaults>
</compile_context>

<pallas_src>
import jax
import jax.numpy as jnp
from jax import lax
from jax.experimental import pallas as pl
from jax.experimental.pallas import tpu as pltpu


# --------------------------------------------------------------------------- #
# Kernels
# --------------------------------------------------------------------------- #
def _bn_stats_kernel(x_ref, sum_ref, sq_ref):
    """Accumulate per-channel sum and sum-of-squares.

    x_ref   : (n_blk, c_blk, hw_blk) input tile (channels on sublanes,
              spatial on lanes).
    sum_ref : (1, c_blk, 1) f32 output block, resident across the (n, hw)
              reduction grid axes (same block index for every n/hw step).
    sq_ref  : (1, c_blk, 1) f32 output block.
    """
    @pl.when(jnp.logical_and(pl.program_id(1) == 0, pl.program_id(2) == 0))
    def _init():
        sum_ref[...] = jnp.zeros_like(sum_ref)
        sq_ref[...] = jnp.zeros_like(sq_ref)

    x = x_ref[...].astype(jnp.float32)
    # keepdims => result shape (1, c_blk, 1) matches the resident output block
    # exactly: lane reduce goes to the XLU, batch reduce is plain VPU adds.
    sum_ref[...] += jnp.sum(x, axis=(0, 2), keepdims=True)
    sq_ref[...] += jnp.sum(x * x, axis=(0, 2), keepdims=True)


def _bn_apply_kernel(x_ref, scale_ref, shift_ref, y_ref):
    """y = x * scale + shift with per-channel, pre-folded scale/shift.

    x_ref/y_ref        : (n_blk, c_blk, hw_blk)
    scale_ref/shift_ref: (1, c_blk, 1) f32 (broadcast over batch and lanes)
    """
    y = x_ref[...].astype(jnp.float32) * scale_ref[...] + shift_ref[...]
    y_ref[...] = y.astype(y_ref.dtype)


# --------------------------------------------------------------------------- #
# Tiling helpers (generation aware)
# --------------------------------------------------------------------------- #
def _pick_block(dim, align, cap):
    """Largest t <= cap with t % align == 0 and dim % t == 0; else full dim."""
    if dim % align != 0:
        return dim  # full-dim block always satisfies the (8, 128) rule
    cap = max(align, min(cap, dim))
    t = (cap // align) * align
    while t >= align:
        if dim % t == 0:
            return t
        t -= align
    return dim


def _vmem_capacity_bytes():
    phys = 64 * 1024 * 1024  # conservative default = v7x per-core VMEM
    try:
        info = pltpu.get_tpu_info()
        phys = int(getattr(info, "vmem_capacity_bytes", phys))
    except Exception:
        pass
    return phys


def _choose_tiles(N, C, HW, itemsize, vmem_bytes):
    """Pick (n_blk, c_blk, hw_blk) that divide (N, C, HW) exactly.

    One x tile stays well under VMEM so that input + output tiles, each
    double-buffered (4 live copies), plus headroom fit every TPU generation
    (v5e/v6e 128 MiB, v7x 64 MiB).
    """
    tile_budget = max(512 * 1024, min(vmem_bytes // 10, 8 * 1024 * 1024))

    # Lanes first: multiple of 128 (or full HW) — lane-dense loads/stores.
    hw_blk = _pick_block(HW, 128, max(128, tile_budget // itemsize))
    row_bytes = hw_blk * itemsize

    # Channels on sublanes: multiple of 8 (or full C).
    c_blk = _pick_block(C, 8, max(8, tile_budget // max(1, row_bytes)))
    # Prefer >= 2 channel tiles so the "parallel" channel axis can feed both
    # TensorCores on v7x during the stats (reduction) pass.
    if c_blk == C and c_blk % 16 == 0:
        c_blk //= 2

    n_blk = _pick_block(N, 1, max(1, tile_budget // max(1, c_blk * row_bytes)))
    return n_blk, c_blk, hw_blk


# --------------------------------------------------------------------------- #
# Forward
# --------------------------------------------------------------------------- #
def batch_norm2d_forward(x, weight, bias, running_mean, running_var,
                         num_batches_tracked, *, eps=1e-5, momentum=0.1,
                         training=True, track_running_stats=True, affine=True):
    """Functional equivalent of fastreid BatchNorm2d.forward.

    Returns (y, new_running_mean, new_running_var, new_num_batches_tracked).
    """
    N, C, H, W = x.shape
    HW = H * W
    count = N * HW  # elements per channel
    itemsize = jnp.dtype(x.dtype).itemsize

    vmem_bytes = _vmem_capacity_bytes()
    n_blk, c_blk, hw_blk = _choose_tiles(N, C, HW, itemsize, vmem_bytes)
    grid = (C // c_blk, N // n_blk, HW // hw_blk)
    vmem_limit = int(max(32 * 1024 * 1024,
                         min(vmem_bytes * 3 // 4, 100 * 1024 * 1024)))

    # Free, contiguous view: (N, C, H, W) -> (N, C, H*W); spatial on lanes.
    x3 = x.reshape(N, C, HW)
    x_spec = pl.BlockSpec((n_blk, c_blk, hw_blk), lambda c, n, hw: (n, c, hw))
    cvec_spec = pl.BlockSpec((1, c_blk, 1), lambda c, n, hw: (0, c, 0))

    if affine:
        w_c = weight.astype(jnp.float32)
        b_c = bias.astype(jnp.float32)
    else:
        w_c = jnp.ones((C,), jnp.float32)
        b_c = jnp.zeros((C,), jnp.float32)

    new_rm, new_rv, new_nbt = running_mean, running_var, num_batches_tracked

    if training:
        # ---- pass 1: per-channel batch statistics (sum, sum of squares) ---- #
        stats_cost = pl.CostEstimate(
            flops=3 * int(x.size), transcendentals=0,
            bytes_accessed=int(x.size) * itemsize + 2 * C * 4)
        sums, sqs = pl.pallas_call(
            _bn_stats_kernel,
            grid=grid,
            in_specs=[x_spec],
            out_specs=(cvec_spec, cvec_spec),
            out_shape=(jax.ShapeDtypeStruct((1, C, 1), jnp.float32),
                       jax.ShapeDtypeStruct((1, C, 1), jnp.float32)),
            compiler_params=pltpu.CompilerParams(
                dimension_semantics=("parallel", "arbitrary", "arbitrary"),
                vmem_limit_bytes=vmem_limit),
            cost_estimate=stats_cost,
        )(x3)

        mean = sums.reshape(C) / count
        # E[x^2] - E[x]^2 accumulated in f32; clamp tiny negative cancellation.
        var = jnp.maximum(sqs.reshape(C) / count - mean * mean, 0.0)

        if track_running_stats:
            new_nbt = num_batches_tracked + 1
            if momentum is None:
                eaf = 1.0 / new_nbt.astype(jnp.float32)
            else:
                eaf = jnp.float32(momentum)
            n = float(count)
            # Matches PyTorch exactly (including divide-by-zero when n == 1).
            new_rm = eaf * mean + (1.0 - eaf) * running_mean
            new_rv = eaf * var * n / (n - 1.0) + (1.0 - eaf) * running_var
    else:
        mean = running_mean.astype(jnp.float32)
        var = running_var.astype(jnp.float32)

    # ---- fold normalization + affine into per-channel scale/shift (C-sized) -
    inv_std = lax.rsqrt(var + jnp.float32(eps))
    scale = (w_c * inv_std).reshape(1, C, 1)
    shift = (b_c - mean * w_c * inv_std).reshape(1, C, 1)

    # ---- pass 2: streaming normalize + affine (y = x * scale + shift) ------ #
    apply_cost = pl.CostEstimate(
        flops=2 * int(x.size), transcendentals=0,
        bytes_accessed=2 * int(x.size) * itemsize + 2 * C * 4)
    y3 = pl.pallas_call(
        _bn_apply_kernel,
        grid=grid,
        in_specs=[x_spec, cvec_spec, cvec_spec],
        out_specs=x_spec,
        out_shape=jax.ShapeDtypeStruct((N, C, HW), x.dtype),
        compiler_params=pltpu.CompilerParams(
            dimension_semantics=("parallel", "parallel", "parallel"),
            vmem_limit_bytes=vmem_limit),
        cost_estimate=apply_cost,
    )(x3, scale, shift)

    return y3.reshape(N, C, H, W), new_rm, new_rv, new_nbt


# --------------------------------------------------------------------------- #
# Demo / self-check
# --------------------------------------------------------------------------- #
if __name__ == "__main__":
    # Module init matches reset_parameters / reset_running_stats:
    #   weight=ones(C), bias=zeros(C), running_mean=zeros(C), running_var=ones(C)
    N, C, H, W = 2, 4, 16, 16
    eps, momentum = 1e-5, 0.1
    key = jax.random.PRNGKey(0)
    x = jax.random.normal(key, (N, C, H, W), dtype=jnp.float32)

    weight = jnp.ones((C,), jnp.float32)
    bias = jnp.zeros((C,), jnp.float32)
    running_mean = jnp.zeros((C,), jnp.float32)
    running_var = jnp.ones((C,), jnp.float32)
    # num_batches_tracked is int64 in PyTorch; int32 here (JAX default x64 off).
    num_batches_tracked = jnp.array(0, jnp.int32)

    y, rm, rv, nbt = batch_norm2d_forward(
        x, weight, bias, running_mean, running_var, num_batches_tracked,
        eps=eps, momentum=momentum, training=True)
    jax.block_until_ready((y, rm, rv, nbt))

    # Pure-JAX reference (same math as the PyTorch module in train mode).
    mean_ref = x.mean(axis=(0, 2, 3))
    var_ref = x.var(axis=(0, 2, 3))  # biased
    y_ref = (x - mean_ref[None, :, None, None]) / jnp.sqrt(
        var_ref[None, :, None, None] + eps)
    y_ref = y_ref * weight[None, :, None, None] + bias[None, :, None, None]
    n_el = float(N * H * W)
    rm_ref = momentum * mean_ref + (1 - momentum) * running_mean
    rv_ref = momentum * var_ref * n_el / (n_el - 1.0) + (1 - momentum) * running_var

    assert jnp.allclose(y, y_ref, atol=1e-4, rtol=1e-4), "train output mismatch"
    assert jnp.allclose(rm, rm_ref, atol=1e-5, rtol=1e-5), "running_mean mismatch"
    assert jnp.allclose(rv, rv_ref, atol=1e-5, rtol=1e-5), "running_var mismatch"
    assert int(nbt) == 1, "num_batches_tracked mismatch"

    # Eval path uses the (updated) running statistics.
    y_eval, _, _, _ = batch_norm2d_forward(
        x, weight, bias, rm, rv, nbt, eps=eps, momentum=momentum, training=False)
    jax.block_until_ready(y_eval)
    y_eval_ref = (x - rm[None, :, None, None]) / jnp.sqrt(
        rv[None, :, None, None] + eps)
    y_eval_ref = y_eval_ref * weight[None, :, None, None] + bias[None, :, None, None]
    assert jnp.allclose(y_eval, y_eval_ref, atol=1e-4, rtol=1e-4), "eval mismatch"

    print("KERNEL_OK")
</pallas_src>

<mosaic_0001>
module attributes {stable_mosaic.version = 11 : i64} {
  func.func @_bn_stats_kernel(%arg0: i32, %arg1: i32, %arg2: i32, %arg3: memref<2x4x256xf32, #tpu.memory_space<vmem>>, %arg4: memref<1x4x1xf32, #tpu.memory_space<vmem>>, %arg5: memref<1x4x1xf32, #tpu.memory_space<vmem>>) attributes {dimension_semantics = [#tpu.dimension_semantics<parallel>, #tpu.dimension_semantics<arbitrary>, #tpu.dimension_semantics<arbitrary>], iteration_bounds = array<i64: 1, 1, 1>, scalar_prefetch = 0 : i64, scratch_operands = 0 : i64, tpu.core_type = #tpu.core_type<tc>, window_params = [{transform_indices = @transform_0, window_bounds = array<i64: 2, 4, 256>}, {transform_indices = @transform_1, window_bounds = array<i64: 1, 4, 1>}, {transform_indices = @transform_2, window_bounds = array<i64: 1, 4, 1>}]} {
    %c0_i32 = arith.constant 0 : i32
    %0 = arith.cmpi eq, %arg1, %c0_i32 : i32
    %c0_i32_0 = arith.constant 0 : i32
    %1 = arith.cmpi eq, %arg2, %c0_i32_0 : i32
    %2 = arith.andi %0, %1 : i1
    %3 = arith.extui %2 : i1 to i32
    %c0_i32_1 = arith.constant 0 : i32
    %4 = arith.cmpi ne, %3, %c0_i32_1 : i32
    scf.if %4 {
      %cst_17 = arith.constant 0.000000e+00 : f32
      %17 = vector.broadcast %cst_17 : f32 to vector<1x4x1xf32>
      %c0_18 = arith.constant 0 : index
      %c0_19 = arith.constant 0 : index
      %c0_20 = arith.constant 0 : index
      %18 = vector.load %arg4[%c0_18, %c0_19, %c0_20] : memref<1x4x1xf32, #tpu.memory_space<vmem>>, vector<1x4x1xf32>
      tpu.vector_store %arg4[%c0_18, %c0_19, %c0_20], %17 {strides = array<i32>} : memref<1x4x1xf32, #tpu.memory_space<vmem>>, vector<1x4x1xf32>,
      %cst_21 = arith.constant 0.000000e+00 : f32
      %19 = vector.broadcast %cst_21 : f32 to vector<1x4x1xf32>
      %c0_22 = arith.constant 0 : index
      %c0_23 = arith.constant 0 : index
      %c0_24 = arith.constant 0 : index
      %20 = vector.load %arg5[%c0_22, %c0_23, %c0_24] : memref<1x4x1xf32, #tpu.memory_space<vmem>>, vector<1x4x1xf32>
      tpu.vector_store %arg5[%c0_22, %c0_23, %c0_24], %19 {strides = array<i32>} : memref<1x4x1xf32, #tpu.memory_space<vmem>>, vector<1x4x1xf32>,
    } else {
    }
    %c0 = arith.constant 0 : index
    %c0_2 = arith.constant 0 : index
    %c0_3 = arith.constant 0 : index
    %5 = vector.load %arg3[%c0, %c0_2, %c0_3] : memref<2x4x256xf32, #tpu.memory_space<vmem>>, vector<2x4x256xf32>
    %c0_4 = arith.constant 0 : index
    %c0_5 = arith.constant 0 : index
    %c0_6 = arith.constant 0 : index
    %6 = vector.load %arg4[%c0_4, %c0_5, %c0_6] : memref<1x4x1xf32, #tpu.memory_space<vmem>>, vector<1x4x1xf32>
    %cst = arith.constant dense<0.000000e+00> : vector<4xf32>
    %7 = vector.multi_reduction <add>, %5, %cst [0, 2] : vector<2x4x256xf32> to vector<4xf32>
    %8 = vector.shape_cast %7 : vector<4xf32> to vector<1x4x1xf32>
    %9 = arith.addf %6, %8 : vector<1x4x1xf32>
    %c0_7 = arith.constant 0 : index
    %c0_8 = arith.constant 0 : index
    %c0_9 = arith.constant 0 : index
    %10 = vector.load %arg4[%c0_7, %c0_8, %c0_9] : memref<1x4x1xf32, #tpu.memory_space<vmem>>, vector<1x4x1xf32>
    tpu.vector_store %arg4[%c0_7, %c0_8, %c0_9], %9 {strides = array<i32>} : memref<1x4x1xf32, #tpu.memory_space<vmem>>, vector<1x4x1xf32>,
    %c0_10 = arith.constant 0 : index
    %c0_11 = arith.constant 0 : index
    %c0_12 = arith.constant 0 : index
    %11 = vector.load %arg5[%c0_10, %c0_11, %c0_12] : memref<1x4x1xf32, #tpu.memory_space<vmem>>, vector<1x4x1xf32>
    %12 = arith.mulf %5, %5 : vector<2x4x256xf32>
    %cst_13 = arith.constant dense<0.000000e+00> : vector<4xf32>
    %13 = vector.multi_reduction <add>, %12, %cst_13 [0, 2] : vector<2x4x256xf32> to vector<4xf32>
    %14 = vector.shape_cast %13 : vector<4xf32> to vector<1x4x1xf32>
    %15 = arith.addf %11, %14 : vector<1x4x1xf32>
    %c0_14 = arith.constant 0 : index
    %c0_15 = arith.constant 0 : index
    %c0_16 = arith.constant 0 : index
    %16 = vector.load %arg5[%c0_14, %c0_15, %c0_16] : memref<1x4x1xf32, #tpu.memory_space<vmem>>, vector<1x4x1xf32>
    tpu.vector_store %arg5[%c0_14, %c0_15, %c0_16], %15 {strides = array<i32>} : memref<1x4x1xf32, #tpu.memory_space<vmem>>, vector<1x4x1xf32>,
    return
  }
  func.func @transform_0(%arg0: i32, %arg1: i32, %arg2: i32) -> (i32, i32, i32) {
    %c0_i32 = arith.constant 0 : i32
    return %arg1, %arg0, %arg2 : i32, i32, i32
  }
  func.func @transform_1(%arg0: i32, %arg1: i32, %arg2: i32) -> (i32, i32, i32) {
    %c0_i32 = arith.constant 0 : i32
    %c0_i32_0 = arith.constant 0 : i32
    %c0_i32_1 = arith.constant 0 : i32
    return %c0_i32, %arg0, %c0_i32_0 : i32, i32, i32
  }
  func.func @transform_2(%arg0: i32, %arg1: i32, %arg2: i32) -> (i32, i32, i32) {
    %c0_i32 = arith.constant 0 : i32
    %c0_i32_0 = arith.constant 0 : i32
    %c0_i32_1 = arith.constant 0 : i32
    return %c0_i32, %arg0, %c0_i32_0 : i32, i32, i32
  }
}

</mosaic_0001>

<bundles_post_ra>
// kernel: tpu_custom_call.1
= control target key start
LH: loop header
LB: loop body
LE: loop exit
PB: predicated region body
PF: predicated region fallthrough
CT: control target
= control target key end

     0   :  { %8 = vsyncpa [#allocation3], 0  ;;  %s114_s9 = smov [#allocation2]   ;;  %s175_s0 = inlined_call_operand.hbm [shape: f32[2,4,256], index: 0, kind: input, shape index: {}]   ;;  %s176_s1 = inlined_call_operand.vmem [shape: f32[1,4,1], index: 1, kind: output, shape index: {0}]   ;;  %s177_s2 = inlined_call_operand.vmem [shape: f32[1,4,1], index: 2, kind: output, shape index: {1}]  }
   0x1   :  { %s14_s10 = sshll.u32 %s114_s9, 4  ;;  %s90_s13 = scalar_lea.hbm %s175_s0, 256  ;;  %s15_s10 = int_to_ptr.vmem [resolvable:$true] %s14_s10 }
   0x2   :  { %p91_p0 = scmp.ne.s32.totalorder %s175_s0, %s90_s13  ;;  %p94_p1 = scmp.lt.u32.totalorder %s90_s13, %s175_s0 }
   0x4   :  { %p96_p2 = pnand %p94_p1, %p91_p0 }
   0x6   :  { %99 = shalt.err (!%p96_p2)
}
   0x7   :  { %s100_s18 = scalar_lea.vmem %s15_s10, 256  ;;  %p105_p4 = scmp.lt.s32.totalorder %s15_s10, %s15_s10 }
   0x8   :  { %p101_p3 = scmp.ne.s32.totalorder %s15_s10, %s100_s18  ;;  %p106_p5 = scmp.lt.s32.totalorder %s100_s18, %s100_s18 }
   0xa   :  { %p107_p6 = por %p106_p5, %p105_p4 }
   0xc   :  { %p108_p7 = pnand %p107_p6, %p101_p3 }
   0xe   :  { %111 = shalt.err (!%p108_p7)
}
   0xf   :  { %s115_s19 = smov 128   ;;  %s116_s20 = smov 8  }
  0x10   :  { %20 = dma.hbm_to_vmem [thread:$0]  %s175_s0, 256, %s15_s10, [#allocation3], %s115_s19, %s115_s19, %s116_s20  }
  0x11   :  { %112 = dma.done.wait [#allocation3], 256  }
  0x12   :  { %113 = vsyncadd [#allocation3], 4294967040  ;;  %vm30_vm0 = vcmask 3072   ;;  %v117_v0 = vmov 0.0   ;;  %vm42_vm1 = vcmask 1043456   ;;  %v33_v1 = vld [vmem:[#allocation2] sm:$0xff] }
  0x13   :  { %31 = vst.msk [vmem:[%s176_s1] sm:$0xf] %vm30_vm0, %v117_v0  ;;  %32 = vst.msk [vmem:[%s177_s2] sm:$0xf] %vm30_vm0, %v117_v0  ;;  %v34_v2 = vld [vmem:[#allocation2 + $0x8] sm:$0xff]  ;;  %v38_v3 = vcombine.high %v33_v1, %v33_v1  ;;  %v43_v5 = vsel %vm42_vm1, %v33_v1, 0.0  ;;  %v56_v6 = vmul.f32 %v33_v1, %v33_v1 }
  0x14   :  { %v39_v4 = vcombine.high %v34_v2, %v34_v2  ;;  %v57_v7 = vmul.f32 %v34_v2, %v34_v2  ;;  %v46_v9 = vsel %vm42_vm1, %v34_v2, 0.0 }
  0x15   :  { %v44_v8 = vsel %vm42_vm1, %v38_v3, 0.0  ;;  %v60_v11 = vcombine.high %v56_v6, %v56_v6  ;;  %v64_v13 = vsel %vm42_vm1, %v56_v6, 0.0 }
  0x16   :  { %v45_v10 = vadd.f32 %v44_v8, %v43_v5  ;;  %v61_v12 = vcombine.high %v57_v7, %v57_v7  ;;  %v48_v14 = vsel %vm42_vm1, %v39_v4, 0.0  ;;  %v67_v17 = vsel %vm42_vm1, %v57_v7, 0.0 }
  0x17   :  { %v65_v16 = vsel %vm42_vm1, %v60_v11, 0.0 }
  0x18   :  { %v47_v15 = vadd.f32 %v46_v9, %v45_v10  ;;  %v66_v18 = vadd.f32 %v65_v16, %v64_v13  ;;  %v69_v20 = vsel %vm42_vm1, %v61_v12, 0.0 }
  0x1a   :  { %v49_v19 = vadd.f32 %v48_v14, %v47_v15  ;;  %v68_v21 = vadd.f32 %v67_v17, %v66_v18  ;;  %v35_v23 = vld [vmem:[%s176_s1] sm:$0xf] }
  0x1b   :  { %v55_v26 = vld [vmem:[%s177_s2] sm:$0xf] }
  0x1c   :  { %50 = vadd.xlane.f32.xlu0 %v49_v19  ;;  %v70_v22 = vadd.f32 %v69_v20, %v68_v21 }
  0x20   :  { %71 = vadd.xlane.f32.xlu0 %v70_v22 }
  0xa9   :  { %v51_v24 = vpop.xlane.xlu0 %50 }
  0xaa   :  { %v52_v25 = vadd.f32 %v51_v24, %v35_v23 }
  0xac   :  { %54 = vst.msk [vmem:[%s176_s1] sm:$0xf] %vm30_vm0, %v52_v25 }
  0xad   :  { %v72_v27 = vpop.xlane.xlu0 %71 }
  0xae   :  { %v73_v28 = vadd.f32 %v72_v27, %v55_v26 }
  0xb0   :  { %74 = vst.msk [vmem:[%s177_s2] sm:$0xf] %vm30_vm0, %v73_v28 }
  0xb1   :  { %83 = vsyncpa [#allocation3], 1 }

</bundles_post_ra>
